<compile_context>
chip_gen: v7x
topology: tpu7x:2x2x1
jax: 0.10.0
libtpu: 0.0.40
codegen_flags: <defaults>
</compile_context>

<pallas_src>
import jax
import jax.numpy as jnp
from jax.experimental import pallas as pl
from jax.experimental.pallas import tpu as pltpu

H = 32          # hidden size
T = 3           # sequence length (view(-1, 3*32) in the reference)
H4 = 4 * H      # 128 gate rows (i, f, g, o) -> sublane-aligned 32-row slices
KR = 40         # recurrence-matmul K: 32 h rows + 1 x_t row + 1 ones row + 6 zero-pad rows


def _sigmoid(x):
    # sigmoid(x) = 0.5 * (1 + tanh(x/2)): 1 EUP push + 2 cheap VPU ops (vs exp + reciprocal).
    return 0.5 * jnp.tanh(0.5 * x) + 0.5


def lstm_mlp_kernel(x_ref, a_ref, w12_ref, head_ref, out_ref, rhs_ref, feat_ref):
    # x_ref   : (T, TB)    inputs, batch on lanes
    # a_ref   : (4H, KR)   [Whh | Wih | b_ih+b_hh | 0...] in PyTorch gate order i, f, g, o
    # w12_ref : (8, 3H)    fused fc2 @ fc1 (no nonlinearity between them in the reference)
    # head_ref: (8, 3)     col 0 = fused fc1/fc2 bias, col 1 = fc3 weight, [0, 2] = fc3 bias
    # out_ref : (1, TB)
    # rhs_ref : (KR, TB)   VMEM scratch: rows 0..31 = h, 32 = x_t, 33 = 1, 34..39 = 0
    # feat_ref: (3H, TB)   VMEM scratch: rows [32t, 32t+32) = relu(h_t)
    TB = x_ref.shape[1]
    A = a_ref[...]                                            # (4H, KR), resident

    # (Re)initialize the recurrence RHS every grid step (scratch persists across steps).
    rhs_ref[0:H, :] = jnp.zeros((H, TB), jnp.float32)         # h0 = 0
    rhs_ref[H:KR, :] = jnp.zeros((KR - H, TB), jnp.float32)   # x_t / ones / pad rows
    rhs_ref[H + 1:H + 2, :] = jnp.ones((1, TB), jnp.float32)  # ones row for the bias column

    c = jnp.zeros((H, TB), jnp.float32)

    # Static unroll over the tiny sequence.
    for t in range(T):
        rhs_ref[H:H + 1, :] = x_ref[t:t + 1, :]               # x_t row
        # Single MXU op per step: Whh@h + Wih*x_t + (b_ih + b_hh).
        gates = jnp.dot(A, rhs_ref[...], preferred_element_type=jnp.float32)  # (4H, TB)
        i_g = _sigmoid(gates[0 * H:1 * H, :])
        f_g = _sigmoid(gates[1 * H:2 * H, :])
        g_g = jnp.tanh(gates[2 * H:3 * H, :])
        o_g = _sigmoid(gates[3 * H:4 * H, :])
        c = f_g * c + i_g * g_g
        h = o_g * jnp.tanh(c)
        if t + 1 < T:
            rhs_ref[0:H, :] = h                               # recurrent state for next step
        # ReLU on the LSTM outputs (not on the carried state), stacked for the fc head.
        feat_ref[t * H:(t + 1) * H, :] = jnp.maximum(h, 0.0)

    # Fused fc1+fc2 as one K=96 matmul, then ReLU.
    y = jnp.dot(w12_ref[...], feat_ref[...], preferred_element_type=jnp.float32)  # (8, TB)
    y = jnp.maximum(y + head_ref[:, 0:1], 0.0)
    # fc3 (8 -> 1) as a sublane reduction; result is lane-dense (1, TB).
    out_ref[...] = (jnp.sum(head_ref[:, 1:2] * y, axis=0, keepdims=True)
                    + head_ref[0:1, 2:3])


def _round_up(x, m):
    return (x + m - 1) // m * m


def lstm_forward(x, params, *, tb_cap=2048):
    # tb_cap: max batch tile (lanes). Sweepable (1024/2048/4096); 2048 fits comfortably
    # inside every generation's default scoped-VMEM limit (no vmem_limit override needed).
    B = x.shape[0]
    # NOTE: for very large B on v5e, produce x in (T, B) layout upstream to avoid this
    # extra transpose pass over HBM; it is negligible on v6e/v7x.
    x2 = x.reshape(B, T).astype(jnp.float32).T                # (T, B): batch on lanes

    B128 = _round_up(max(B, 1), 128)                          # lane-dense batch
    if B128 <= 2 * tb_cap:
        # >= 2 grid steps whenever the batch spans more than one 128-lane tile so the
        # "parallel" axis shards across v7x's two TensorCores.
        TB = max(128, _round_up(pl.cdiv(B128, 2), 128))
    else:
        TB = tb_cap
    nb = pl.cdiv(B128, TB)
    Bp = nb * TB
    if Bp != B:
        x2 = jnp.pad(x2, ((0, 0), (0, Bp - B)))               # zero-pad: padded lanes are inert

    # Weights: constant block index -> resident in VMEM, no re-DMA across grid steps.
    full = lambda shape: pl.BlockSpec(shape, lambda i: (0, 0))
    grid_spec = pltpu.PrefetchScalarGridSpec(
        num_scalar_prefetch=0,
        grid=(nb,),
        in_specs=[
            pl.BlockSpec((T, TB), lambda i: (0, i)),          # x, tiled over batch lanes
            full(params["A"].shape),
            full(params["w12"].shape),
            full(params["head"].shape),
        ],
        out_specs=pl.BlockSpec((1, TB), lambda i: (0, i)),
        scratch_shapes=[
            pltpu.VMEM((KR, TB), jnp.float32),                # recurrence RHS [h; x_t; 1; 0]
            pltpu.VMEM((T * H, TB), jnp.float32),             # relu(h_t) feature stack
        ],
    )
    out = pl.pallas_call(
        lstm_mlp_kernel,
        out_shape=jax.ShapeDtypeStruct((1, Bp), jnp.float32),
        grid_spec=grid_spec,
        compiler_params=pltpu.CompilerParams(
            dimension_semantics=("parallel",)),
    )(x2, params["A"], params["w12"], params["head"])
    return out[:, :B].reshape(B, 1)


def init_params(key):
    # Deterministic init mimicking PyTorch default uniform ranges.
    ks = jax.random.split(key, 10)

    def u(k, shape, bound):
        return jax.random.uniform(k, shape, jnp.float32, -bound, bound)

    s_lstm = 1.0 / jnp.sqrt(H)
    w_ih = u(ks[0], (H4, 1), s_lstm)              # weight_ih_l0 (input_size == 1)
    w_hh = u(ks[1], (H4, H), s_lstm)              # weight_hh_l0
    b_ih = u(ks[2], (H4,), s_lstm)
    b_hh = u(ks[3], (H4,), s_lstm)

    s1 = 1.0 / jnp.sqrt(3.0 * H)
    w1 = u(ks[4], (16, 3 * H), s1)
    b1 = u(ks[5], (16,), s1)
    s2 = 1.0 / jnp.sqrt(16.0)
    w2 = u(ks[6], (8, 16), s2)
    b2 = u(ks[7], (8,), s2)
    s3 = 1.0 / jnp.sqrt(8.0)
    w3 = u(ks[8], (1, 8), s3)
    b3 = u(ks[9], (1,), s3)

    # Recurrence LHS: gates = A @ [h; x_t; 1; 0_pad]  (PyTorch gate order i, f, g, o).
    A = jnp.zeros((H4, KR), jnp.float32)
    A = A.at[:, 0:H].set(w_hh)
    A = A.at[:, H].set(w_ih[:, 0])
    A = A.at[:, H + 1].set(b_ih + b_hh)

    # Offline fusion of fc1+fc2 (the reference applies no nonlinearity between them).
    w12 = w2 @ w1                                 # (8, 96)
    b12 = w2 @ b1 + b2                            # (8,)
    b3_col = jnp.zeros((8,), jnp.float32).at[0].set(b3[0])
    head = jnp.stack([b12, w3[0], b3_col], axis=1)            # (8, 3)

    packed = {"A": A, "w12": w12, "head": head}
    raw = {"w_ih": w_ih, "w_hh": w_hh, "b_ih": b_ih, "b_hh": b_hh,
           "w1": w1, "b1": b1, "w2": w2, "b2": b2, "w3": w3, "b3": b3}
    return packed, raw


def reference_forward(x, raw):
    # Pure-JAX mirror of the PyTorch module (for correctness check).
    B = x.shape[0]
    h = jnp.zeros((B, H), jnp.float32)
    c = jnp.zeros((B, H), jnp.float32)
    hs = []
    hp = jax.lax.Precision.HIGHEST
    for t in range(T):
        xt = x[:, t, :]
        gates = (jnp.dot(xt, raw["w_ih"].T, precision=hp)
                 + jnp.dot(h, raw["w_hh"].T, precision=hp)
                 + raw["b_ih"] + raw["b_hh"])
        i_g = jax.nn.sigmoid(gates[:, 0 * H:1 * H])
        f_g = jax.nn.sigmoid(gates[:, 1 * H:2 * H])
        g_g = jnp.tanh(gates[:, 2 * H:3 * H])
        o_g = jax.nn.sigmoid(gates[:, 3 * H:4 * H])
        c = f_g * c + i_g * g_g
        h = o_g * jnp.tanh(c)
        hs.append(jnp.maximum(h, 0.0))
    feat = jnp.concatenate(hs, axis=-1)
    y = jnp.dot(feat, raw["w1"].T, precision=hp) + raw["b1"]
    y = jnp.dot(y, raw["w2"].T, precision=hp) + raw["b2"]
    y = jnp.maximum(y, 0.0)
    y = jnp.dot(y, raw["w3"].T, precision=hp) + raw["b3"]
    return y


if __name__ == "__main__":
    key = jax.random.PRNGKey(0)
    k_x, k_x2, k_p = jax.random.split(key, 3)
    packed, raw = init_params(k_p)

    # Small shape (batch=8, seq=3, input=1) as implied by the module.
    B = 8
    x = jax.random.normal(k_x, (B, T, 1), jnp.float32)
    out = lstm_forward(x, packed)
    jax.block_until_ready(out)
    assert out.shape == (B, 1) and out.dtype == jnp.float32
    ref = reference_forward(x, raw)
    assert jnp.allclose(out, ref, atol=1e-3, rtol=1e-3), (out, ref)

    # Exercise the padded, multi-tile "parallel" grid path.
    B2 = 300
    xb = jax.random.normal(k_x2, (B2, T, 1), jnp.float32)
    out2 = lstm_forward(xb, packed)
    jax.block_until_ready(out2)
    ref2 = reference_forward(xb, raw)
    assert out2.shape == (B2, 1)
    assert jnp.allclose(out2, ref2, atol=1e-3, rtol=1e-3)

    print("KERNEL_OK")
</pallas_src>

<mosaic_0001>
module attributes {stable_mosaic.version = 11 : i64} {
  func.func @lstm_mlp_kernel(%arg0: i32, %arg1: memref<3x128xf32, #tpu.memory_space<vmem>>, %arg2: memref<128x40xf32, #tpu.memory_space<vmem>>, %arg3: memref<8x96xf32, #tpu.memory_space<vmem>>, %arg4: memref<8x3xf32, #tpu.memory_space<vmem>>, %arg5: memref<1x128xf32, #tpu.memory_space<vmem>>, %arg6: memref<40x128xf32, #tpu.memory_space<vmem>>, %arg7: memref<96x128xf32, #tpu.memory_space<vmem>>) attributes {dimension_semantics = [#tpu.dimension_semantics<parallel>], iteration_bounds = array<i64: 1>, scalar_prefetch = 0 : i64, scratch_operands = 2 : i64, tpu.core_type = #tpu.core_type<tc>, window_params = [{transform_indices = @transform_0, window_bounds = array<i64: 3, 128>}, {pipeline_mode = #tpu.pipeline_mode<synchronous>, transform_indices = @transform_1, window_bounds = array<i64: 128, 40>}, {pipeline_mode = #tpu.pipeline_mode<synchronous>, transform_indices = @transform_2, window_bounds = array<i64: 8, 96>}, {pipeline_mode = #tpu.pipeline_mode<synchronous>, transform_indices = @transform_3, window_bounds = array<i64: 8, 3>}, {transform_indices = @transform_4, window_bounds = array<i64: 1, 128>}]} {
    %c0 = arith.constant 0 : index
    %c0_0 = arith.constant 0 : index
    %0 = vector.load %arg2[%c0, %c0_0] : memref<128x40xf32, #tpu.memory_space<vmem>>, vector<128x40xf32>
    %cst = arith.constant 0.000000e+00 : f32
    %1 = vector.broadcast %cst : f32 to vector<32x128xf32>
    %c0_1 = arith.constant 0 : index
    %c0_2 = arith.constant 0 : index
    %2 = vector.load %arg6[%c0_1, %c0_2] : memref<40x128xf32, #tpu.memory_space<vmem>>, vector<32x128xf32>
    tpu.vector_store %arg6[%c0_1, %c0_2], %1 {strides = array<i32>} : memref<40x128xf32, #tpu.memory_space<vmem>>, vector<32x128xf32>,
    %cst_3 = arith.constant 0.000000e+00 : f32
    %3 = vector.broadcast %cst_3 : f32 to vector<8x128xf32>
    %c32 = arith.constant 32 : index
    %c0_4 = arith.constant 0 : index
    %4 = vector.load %arg6[%c32, %c0_4] : memref<40x128xf32, #tpu.memory_space<vmem>>, vector<8x128xf32>
    tpu.vector_store %arg6[%c32, %c0_4], %3 {strides = array<i32>} : memref<40x128xf32, #tpu.memory_space<vmem>>, vector<8x128xf32>,
    %cst_5 = arith.constant 1.000000e+00 : f32
    %5 = vector.broadcast %cst_5 : f32 to vector<1x128xf32>
    %c33 = arith.constant 33 : index
    %c0_6 = arith.constant 0 : index
    %6 = vector.load %arg6[%c33, %c0_6] : memref<40x128xf32, #tpu.memory_space<vmem>>, vector<1x128xf32>
    tpu.vector_store %arg6[%c33, %c0_6], %5 {strides = array<i32>} : memref<40x128xf32, #tpu.memory_space<vmem>>, vector<1x128xf32>,
    %cst_7 = arith.constant 0.000000e+00 : f32
    %7 = vector.broadcast %cst_7 : f32 to vector<32x128xf32>
    %c0_8 = arith.constant 0 : index
    %c0_9 = arith.constant 0 : index
    %8 = vector.load %arg1[%c0_8, %c0_9] : memref<3x128xf32, #tpu.memory_space<vmem>>, vector<1x128xf32>
    %c32_10 = arith.constant 32 : index
    %c0_11 = arith.constant 0 : index
    %9 = vector.load %arg6[%c32_10, %c0_11] : memref<40x128xf32, #tpu.memory_space<vmem>>, vector<1x128xf32>
    tpu.vector_store %arg6[%c32_10, %c0_11], %8 {strides = array<i32>} : memref<40x128xf32, #tpu.memory_space<vmem>>, vector<1x128xf32>,
    %c0_12 = arith.constant 0 : index
    %c0_13 = arith.constant 0 : index
    %10 = vector.load %arg6[%c0_12, %c0_13] : memref<40x128xf32, #tpu.memory_space<vmem>>, vector<40x128xf32>
    %cst_14 = arith.constant dense<0.000000e+00> : vector<128x128xf32>
    %11 = tpu.matmul %0, %10, %cst_14 {dimension_numbers = #tpu.dot_dimension_numbers<[1], [0], [0], [1], [0, 0, 1, 1], [], []>} : vector<128x40xf32>, vector<40x128xf32>, vector<128x128xf32> -> vector<128x128xf32>
    %12 = vector.extract_strided_slice %11 {offsets = [0, 0], sizes = [32, 128], strides = [1, 1]} : vector<128x128xf32> to vector<32x128xf32>
    %cst_15 = arith.constant 5.000000e-01 : f32
    %13 = vector.broadcast %cst_15 : f32 to vector<32x128xf32>
    %14 = arith.mulf %13, %12 : vector<32x128xf32>
    %15 = math.tanh %14 : vector<32x128xf32>
    %cst_16 = arith.constant 5.000000e-01 : f32
    %16 = vector.broadcast %cst_16 : f32 to vector<32x128xf32>
    %17 = arith.mulf %16, %15 : vector<32x128xf32>
    %cst_17 = arith.constant 5.000000e-01 : f32
    %18 = vector.broadcast %cst_17 : f32 to vector<32x128xf32>
    %19 = arith.addf %17, %18 : vector<32x128xf32>
    %20 = vector.extract_strided_slice %11 {offsets = [32, 0], sizes = [32, 128], strides = [1, 1]} : vector<128x128xf32> to vector<32x128xf32>
    %cst_18 = arith.constant 5.000000e-01 : f32
    %21 = vector.broadcast %cst_18 : f32 to vector<32x128xf32>
    %22 = arith.mulf %21, %20 : vector<32x128xf32>
    %23 = math.tanh %22 : vector<32x128xf32>
    %cst_19 = arith.constant 5.000000e-01 : f32
    %24 = vector.broadcast %cst_19 : f32 to vector<32x128xf32>
    %25 = arith.mulf %24, %23 : vector<32x128xf32>
    %cst_20 = arith.constant 5.000000e-01 : f32
    %26 = vector.broadcast %cst_20 : f32 to vector<32x128xf32>
    %27 = arith.addf %25, %26 : vector<32x128xf32>
    %28 = vector.extract_strided_slice %11 {offsets = [64, 0], sizes = [32, 128], strides = [1, 1]} : vector<128x128xf32> to vector<32x128xf32>
    %29 = math.tanh %28 : vector<32x128xf32>
    %30 = vector.extract_strided_slice %11 {offsets = [96, 0], sizes = [32, 128], strides = [1, 1]} : vector<128x128xf32> to vector<32x128xf32>
    %cst_21 = arith.constant 5.000000e-01 : f32
    %31 = vector.broadcast %cst_21 : f32 to vector<32x128xf32>
    %32 = arith.mulf %31, %30 : vector<32x128xf32>
    %33 = math.tanh %32 : vector<32x128xf32>
    %cst_22 = arith.constant 5.000000e-01 : f32
    %34 = vector.broadcast %cst_22 : f32 to vector<32x128xf32>
    %35 = arith.mulf %34, %33 : vector<32x128xf32>
    %cst_23 = arith.constant 5.000000e-01 : f32
    %36 = vector.broadcast %cst_23 : f32 to vector<32x128xf32>
    %37 = arith.addf %35, %36 : vector<32x128xf32>
    %38 = arith.mulf %27, %7 : vector<32x128xf32>
    %39 = arith.mulf %19, %29 : vector<32x128xf32>
    %40 = arith.addf %38, %39 : vector<32x128xf32>
    %41 = math.tanh %40 : vector<32x128xf32>
    %42 = arith.mulf %37, %41 : vector<32x128xf32>
    %c0_24 = arith.constant 0 : index
    %c0_25 = arith.constant 0 : index
    %43 = vector.load %arg6[%c0_24, %c0_25] : memref<40x128xf32, #tpu.memory_space<vmem>>, vector<32x128xf32>
    tpu.vector_store %arg6[%c0_24, %c0_25], %42 {strides = array<i32>} : memref<40x128xf32, #tpu.memory_space<vmem>>, vector<32x128xf32>,
    %cst_26 = arith.constant 0.000000e+00 : f32
    %44 = vector.broadcast %cst_26 : f32 to vector<32x128xf32>
    %45 = arith.maximumf %42, %44 : vector<32x128xf32>
    %c0_27 = arith.constant 0 : index
    %c0_28 = arith.constant 0 : index
    %46 = vector.load %arg7[%c0_27, %c0_28] : memref<96x128xf32, #tpu.memory_space<vmem>>, vector<32x128xf32>
    tpu.vector_store %arg7[%c0_27, %c0_28], %45 {strides = array<i32>} : memref<96x128xf32, #tpu.memory_space<vmem>>, vector<32x128xf32>,
    %c1 = arith.constant 1 : index
    %c0_29 = arith.constant 0 : index
    %47 = vector.load %arg1[%c1, %c0_29] : memref<3x128xf32, #tpu.memory_space<vmem>>, vector<1x128xf32>
    %c32_30 = arith.constant 32 : index
    %c0_31 = arith.constant 0 : index
    %48 = vector.load %arg6[%c32_30, %c0_31] : memref<40x128xf32, #tpu.memory_space<vmem>>, vector<1x128xf32>
    tpu.vector_store %arg6[%c32_30, %c0_31], %47 {strides = array<i32>} : memref<40x128xf32, #tpu.memory_space<vmem>>, vector<1x128xf32>,
    %c0_32 = arith.constant 0 : index
    %c0_33 = arith.constant 0 : index
    %49 = vector.load %arg6[%c0_32, %c0_33] : memref<40x128xf32, #tpu.memory_space<vmem>>, vector<40x128xf32>
    %cst_34 = arith.constant dense<0.000000e+00> : vector<128x128xf32>
    %50 = tpu.matmul %0, %49, %cst_34 {dimension_numbers = #tpu.dot_dimension_numbers<[1], [0], [0], [1], [0, 0, 1, 1], [], []>} : vector<128x40xf32>, vector<40x128xf32>, vector<128x128xf32> -> vector<128x128xf32>
    %51 = vector.extract_strided_slice %50 {offsets = [0, 0], sizes = [32, 128], strides = [1, 1]} : vector<128x128xf32> to vector<32x128xf32>
    %cst_35 = arith.constant 5.000000e-01 : f32
    %52 = vector.broadcast %cst_35 : f32 to vector<32x128xf32>
    %53 = arith.mulf %52, %51 : vector<32x128xf32>
    %54 = math.tanh %53 : vector<32x128xf32>
    %cst_36 = arith.constant 5.000000e-01 : f32
    %55 = vector.broadcast %cst_36 : f32 to vector<32x128xf32>
    %56 = arith.mulf %55, %54 : vector<32x128xf32>
    %cst_37 = arith.constant 5.000000e-01 : f32
    %57 = vector.broadcast %cst_37 : f32 to vector<32x128xf32>
    %58 = arith.addf %56, %57 : vector<32x128xf32>
    %59 = vector.extract_strided_slice %50 {offsets = [32, 0], sizes = [32, 128], strides = [1, 1]} : vector<128x128xf32> to vector<32x128xf32>
    %cst_38 = arith.constant 5.000000e-01 : f32
    %60 = vector.broadcast %cst_38 : f32 to vector<32x128xf32>
    %61 = arith.mulf %60, %59 : vector<32x128xf32>
    %62 = math.tanh %61 : vector<32x128xf32>
    %cst_39 = arith.constant 5.000000e-01 : f32
    %63 = vector.broadcast %cst_39 : f32 to vector<32x128xf32>
    %64 = arith.mulf %63, %62 : vector<32x128xf32>
    %cst_40 = arith.constant 5.000000e-01 : f32
    %65 = vector.broadcast %cst_40 : f32 to vector<32x128xf32>
    %66 = arith.addf %64, %65 : vector<32x128xf32>
    %67 = vector.extract_strided_slice %50 {offsets = [64, 0], sizes = [32, 128], strides = [1, 1]} : vector<128x128xf32> to vector<32x128xf32>
    %68 = math.tanh %67 : vector<32x128xf32>
    %69 = vector.extract_strided_slice %50 {offsets = [96, 0], sizes = [32, 128], strides = [1, 1]} : vector<128x128xf32> to vector<32x128xf32>
    %cst_41 = arith.constant 5.000000e-01 : f32
    %70 = vector.broadcast %cst_41 : f32 to vector<32x128xf32>
    %71 = arith.mulf %70, %69 : vector<32x128xf32>
    %72 = math.tanh %71 : vector<32x128xf32>
    %cst_42 = arith.constant 5.000000e-01 : f32
    %73 = vector.broadcast %cst_42 : f32 to vector<32x128xf32>
    %74 = arith.mulf %73, %72 : vector<32x128xf32>
    %cst_43 = arith.constant 5.000000e-01 : f32
    %75 = vector.broadcast %cst_43 : f32 to vector<32x128xf32>
    %76 = arith.addf %74, %75 : vector<32x128xf32>
    %77 = arith.mulf %66, %40 : vector<32x128xf32>
    %78 = arith.mulf %58, %68 : vector<32x128xf32>
    %79 = arith.addf %77, %78 : vector<32x128xf32>
    %80 = math.tanh %79 : vector<32x128xf32>
    %81 = arith.mulf %76, %80 : vector<32x128xf32>
    %c0_44 = arith.constant 0 : index
    %c0_45 = arith.constant 0 : index
    %82 = vector.load %arg6[%c0_44, %c0_45] : memref<40x128xf32, #tpu.memory_space<vmem>>, vector<32x128xf32>
    tpu.vector_store %arg6[%c0_44, %c0_45], %81 {strides = array<i32>} : memref<40x128xf32, #tpu.memory_space<vmem>>, vector<32x128xf32>,
    %cst_46 = arith.constant 0.000000e+00 : f32
    %83 = vector.broadcast %cst_46 : f32 to vector<32x128xf32>
    %84 = arith.maximumf %81, %83 : vector<32x128xf32>
    %c32_47 = arith.constant 32 : index
    %c0_48 = arith.constant 0 : index
    %85 = vector.load %arg7[%c32_47, %c0_48] : memref<96x128xf32, #tpu.memory_space<vmem>>, vector<32x128xf32>
    tpu.vector_store %arg7[%c32_47, %c0_48], %84 {strides = array<i32>} : memref<96x128xf32, #tpu.memory_space<vmem>>, vector<32x128xf32>,
    %c2 = arith.constant 2 : index
    %c0_49 = arith.constant 0 : index
    %86 = vector.load %arg1[%c2, %c0_49] : memref<3x128xf32, #tpu.memory_space<vmem>>, vector<1x128xf32>
    %c32_50 = arith.constant 32 : index
    %c0_51 = arith.constant 0 : index
    %87 = vector.load %arg6[%c32_50, %c0_51] : memref<40x128xf32, #tpu.memory_space<vmem>>, vector<1x128xf32>
    tpu.vector_store %arg6[%c32_50, %c0_51], %86 {strides = array<i32>} : memref<40x128xf32, #tpu.memory_space<vmem>>, vector<1x128xf32>,
    %c0_52 = arith.constant 0 : index
    %c0_53 = arith.constant 0 : index
    %88 = vector.load %arg6[%c0_52, %c0_53] : memref<40x128xf32, #tpu.memory_space<vmem>>, vector<40x128xf32>
    %cst_54 = arith.constant dense<0.000000e+00> : vector<128x128xf32>
    %89 = tpu.matmul %0, %88, %cst_54 {dimension_numbers = #tpu.dot_dimension_numbers<[1], [0], [0], [1], [0, 0, 1, 1], [], []>} : vector<128x40xf32>, vector<40x128xf32>, vector<128x128xf32> -> vector<128x128xf32>
    %90 = vector.extract_strided_slice %89 {offsets = [0, 0], sizes = [32, 128], strides = [1, 1]} : vector<128x128xf32> to vector<32x128xf32>
    %cst_55 = arith.constant 5.000000e-01 : f32
    %91 = vector.broadcast %cst_55 : f32 to vector<32x128xf32>
    %92 = arith.mulf %91, %90 : vector<32x128xf32>
    %93 = math.tanh %92 : vector<32x128xf32>
    %cst_56 = arith.constant 5.000000e-01 : f32
    %94 = vector.broadcast %cst_56 : f32 to vector<32x128xf32>
    %95 = arith.mulf %94, %93 : vector<32x128xf32>
    %cst_57 = arith.constant 5.000000e-01 : f32
    %96 = vector.broadcast %cst_57 : f32 to vector<32x128xf32>
    %97 = arith.addf %95, %96 : vector<32x128xf32>
    %98 = vector.extract_strided_slice %89 {offsets = [32, 0], sizes = [32, 128], strides = [1, 1]} : vector<128x128xf32> to vector<32x128xf32>
    %cst_58 = arith.constant 5.000000e-01 : f32
    %99 = vector.broadcast %cst_58 : f32 to vector<32x128xf32>
    %100 = arith.mulf %99, %98 : vector<32x128xf32>
    %101 = math.tanh %100 : vector<32x128xf32>
    %cst_59 = arith.constant 5.000000e-01 : f32
    %102 = vector.broadcast %cst_59 : f32 to vector<32x128xf32>
    %103 = arith.mulf %102, %101 : vector<32x128xf32>
    %cst_60 = arith.constant 5.000000e-01 : f32
    %104 = vector.broadcast %cst_60 : f32 to vector<32x128xf32>
    %105 = arith.addf %103, %104 : vector<32x128xf32>
    %106 = vector.extract_strided_slice %89 {offsets = [64, 0], sizes = [32, 128], strides = [1, 1]} : vector<128x128xf32> to vector<32x128xf32>
    %107 = math.tanh %106 : vector<32x128xf32>
    %108 = vector.extract_strided_slice %89 {offsets = [96, 0], sizes = [32, 128], strides = [1, 1]} : vector<128x128xf32> to vector<32x128xf32>
    %cst_61 = arith.constant 5.000000e-01 : f32
    %109 = vector.broadcast %cst_61 : f32 to vector<32x128xf32>
    %110 = arith.mulf %109, %108 : vector<32x128xf32>
    %111 = math.tanh %110 : vector<32x128xf32>
    %cst_62 = arith.constant 5.000000e-01 : f32
    %112 = vector.broadcast %cst_62 : f32 to vector<32x128xf32>
    %113 = arith.mulf %112, %111 : vector<32x128xf32>
    %cst_63 = arith.constant 5.000000e-01 : f32
    %114 = vector.broadcast %cst_63 : f32 to vector<32x128xf32>
    %115 = arith.addf %113, %114 : vector<32x128xf32>
    %116 = arith.mulf %105, %79 : vector<32x128xf32>
    %117 = arith.mulf %97, %107 : vector<32x128xf32>
    %118 = arith.addf %116, %117 : vector<32x128xf32>
    %119 = math.tanh %118 : vector<32x128xf32>
    %120 = arith.mulf %115, %119 : vector<32x128xf32>
    %cst_64 = arith.constant 0.000000e+00 : f32
    %121 = vector.broadcast %cst_64 : f32 to vector<32x128xf32>
    %122 = arith.maximumf %120, %121 : vector<32x128xf32>
    %c64 = arith.constant 64 : index
    %c0_65 = arith.constant 0 : index
    %123 = vector.load %arg7[%c64, %c0_65] : memref<96x128xf32, #tpu.memory_space<vmem>>, vector<32x128xf32>
    tpu.vector_store %arg7[%c64, %c0_65], %122 {strides = array<i32>} : memref<96x128xf32, #tpu.memory_space<vmem>>, vector<32x128xf32>,
    %c0_66 = arith.constant 0 : index
    %c0_67 = arith.constant 0 : index
    %124 = vector.load %arg3[%c0_66, %c0_67] : memref<8x96xf32, #tpu.memory_space<vmem>>, vector<8x96xf32>
    %c0_68 = arith.constant 0 : index
    %c0_69 = arith.constant 0 : index
    %125 = vector.load %arg7[%c0_68, %c0_69] : memref<96x128xf32, #tpu.memory_space<vmem>>, vector<96x128xf32>
    %cst_70 = arith.constant dense<0.000000e+00> : vector<8x128xf32>
    %126 = tpu.matmul %124, %125, %cst_70 {dimension_numbers = #tpu.dot_dimension_numbers<[1], [0], [0], [1], [0, 0, 1, 1], [], []>} : vector<8x96xf32>, vector<96x128xf32>, vector<8x128xf32> -> vector<8x128xf32>
    %c0_71 = arith.constant 0 : index
    %c0_72 = arith.constant 0 : index
    %127 = vector.load %arg4[%c0_71, %c0_72] : memref<8x3xf32, #tpu.memory_space<vmem>>, vector<8x1xf32>
    %128 = vector.broadcast %127 : vector<8x1xf32> to vector<8x128xf32>
    %129 = arith.addf %126, %128 : vector<8x128xf32>
    %cst_73 = arith.constant 0.000000e+00 : f32
    %130 = vector.broadcast %cst_73 : f32 to vector<8x128xf32>
    %131 = arith.maximumf %129, %130 : vector<8x128xf32>
    %c0_74 = arith.constant 0 : index
    %c1_75 = arith.constant 1 : index
    %132 = vector.load %arg4[%c0_74, %c1_75] : memref<8x3xf32, #tpu.memory_space<vmem>>, vector<8x1xf32>
    %133 = vector.broadcast %132 : vector<8x1xf32> to vector<8x128xf32>
    %134 = arith.mulf %133, %131 : vector<8x128xf32>
    %cst_76 = arith.constant dense<0.000000e+00> : vector<128xf32>
    %135 = vector.multi_reduction <add>, %134, %cst_76 [0] : vector<8x128xf32> to vector<128xf32>
    %136 = vector.shape_cast %135 : vector<128xf32> to vector<1x128xf32>
    %c0_77 = arith.constant 0 : index
    %c2_78 = arith.constant 2 : index
    %137 = vector.load %arg4[%c0_77, %c2_78] : memref<8x3xf32, #tpu.memory_space<vmem>>, vector<1x1xf32>
    %138 = vector.broadcast %137 : vector<1x1xf32> to vector<1x128xf32>
    %139 = arith.addf %136, %138 : vector<1x128xf32>
    %c0_79 = arith.constant 0 : index
    %c0_80 = arith.constant 0 : index
    %140 = vector.load %arg5[%c0_79, %c0_80] : memref<1x128xf32, #tpu.memory_space<vmem>>, vector<1x128xf32>
    tpu.vector_store %arg5[%c0_79, %c0_80], %139 {strides = array<i32>} : memref<1x128xf32, #tpu.memory_space<vmem>>, vector<1x128xf32>,
    return
  }
  func.func @transform_0(%arg0: i32) -> (i32, i32) {
    %c0_i32 = arith.constant 0 : i32
    %c0_i32_0 = arith.constant 0 : i32
    return %c0_i32, %arg0 : i32, i32
  }
  func.func @transform_1(%arg0: i32) -> (i32, i32) {
    %c0_i32 = arith.constant 0 : i32
    %c0_i32_0 = arith.constant 0 : i32
    %c0_i32_1 = arith.constant 0 : i32
    return %c0_i32, %c0_i32_0 : i32, i32
  }
  func.func @transform_2(%arg0: i32) -> (i32, i32) {
    %c0_i32 = arith.constant 0 : i32
    %c0_i32_0 = arith.constant 0 : i32
    %c0_i32_1 = arith.constant 0 : i32
    return %c0_i32, %c0_i32_0 : i32, i32
  }
  func.func @transform_3(%arg0: i32) -> (i32, i32) {
    %c0_i32 = arith.constant 0 : i32
    %c0_i32_0 = arith.constant 0 : i32
    %c0_i32_1 = arith.constant 0 : i32
    return %c0_i32, %c0_i32_0 : i32, i32
  }
  func.func @transform_4(%arg0: i32) -> (i32, i32) {
    %c0_i32 = arith.constant 0 : i32
    %c0_i32_0 = arith.constant 0 : i32
    return %c0_i32, %arg0 : i32, i32
  }
}

</mosaic_0001>

<bundles_post_ra>
// kernel: tpu_custom_call.1
= control target key start
LH: loop header
LB: loop body
LE: loop exit
PB: predicated region body
PF: predicated region fallthrough
CT: control target
= control target key end

     0   :  { %vm47_vm0 = vcmask 326656   ;;  %v1378_v2 = vmov 0.0   ;;  %v1379_v3 = vmov 1.0   ;;  %v1380_v4 = vmov 0.0|0.0   ;;  %s1664_s0 = inlined_call_operand.vmem [shape: f32[3,128], index: 0, kind: input, shape index: {}]   ;;  %s1665_s1 = inlined_call_operand.vmem [shape: f32[128,40], index: 1, kind: input, shape index: {}]   ;;  %s1666_s2 = inlined_call_operand.vmem [shape: f32[8,96], index: 2, kind: input, shape index: {}]   ;;  %s1667_s3 = inlined_call_operand.vmem [shape: f32[8,3], index: 3, kind: input, shape index: {}]   ;;  %s1668_s4 = inlined_call_operand.hbm [shape: f32[1,128], index: 4, kind: output, shape index: {}]  }
   0x1   :  { %v40_v0 = vld [vmem:[%s1664_s0] sm:$0x1]  ;;  %38 = vst [vmem:[#allocation2 + $0x20] sm:$0xff] %v1378_v2  ;;  %1175 = vmatprep.subr.bf16.mxu0 %v1380_v4  ;;  %1216 = vmatprep.subr.bf16.mxu1 %v1380_v4  ;;  %v1424_v5 = vld [vmem:[%s1665_s1 + $0x50] sm:$0xff] }
   0x2   :  { %v18_v1 = vld [vmem:[%s1665_s1] sm:$0xff]  ;;  %39 = vst [vmem:[#allocation2 + $0x21] sm:$0x1] %v1379_v3  ;;  %41 = vst [vmem:[#allocation2 + $0x20] sm:$0x1] %v40_v0  ;;  %1177 = vmatpush3.bf16.msra.mxu0 %v1380_v4  ;;  %1219 = vmatpush3.bf16.msra.mxu1 %v1380_v4 }
   0x3   :  { %1055 = vmatprep.mubr.msk.f32.mxu0 %vm47_vm0, %v18_v1  ;;  %1179 = vmatprep.subr.bf16.mxu0 %v1380_v4 }
   0x4   :  { %1217 = vmatprep.subr.bf16.mxu1 %v1380_v4  ;;  %1070 = vmatprep.mubr.msk.f32.mxu1 %vm47_vm0, %v1424_v5 }
   0x5   :  { %9 = vsyncpa [#allocation5], 0  ;;  %v1437_v7 = vld [vmem:[%s1665_s1 + $0x8] sm:$0xff]  ;;  %v1442_v8 = vld [vmem:[%s1665_s1 + $0x58] sm:$0xff]  ;;  %vm1381_vm1 = vmmov 0   ;;  %vm812_vm2 = vcmask 785408  }
   0x6   :  { %1181 = vmatpush3.bf16.msra.mxu0 %v1380_v4  ;;  %1220 = vmatpush3.bf16.msra.mxu1 %v1380_v4  ;;  %v1447_v9 = vld [vmem:[%s1665_s1 + $0x10] sm:$0xff]  ;;  %v1452_v10 = vld [vmem:[%s1665_s1 + $0x60] sm:$0xff]  ;;  %v1463_v11 = vld [vmem:[%s1665_s1 + $0x18] sm:$0xff]  ;;  %s1385_s30 = smov [#allocation4]  }
   0x7   :  { %v1470_v12 = vld [vmem:[%s1665_s1 + $0x68] sm:$0xff]  ;;  %v1475_v13 = vld [vmem:[%s1665_s1 + $0x20] sm:$0xff]  ;;  %v1480_v14 = vld [vmem:[%s1665_s1 + $0x70] sm:$0xff]  ;;  %s912_s5 = sshll.u32 %s1385_s30, 4  ;;  %s913_s5 = int_to_ptr.vmem [resolvable:$true] %s912_s5 }
   0x8   :  { %v1491_v15 = vld [vmem:[%s1665_s1 + $0x28] sm:$0xff]  ;;  %v1498_v16 = vld [vmem:[%s1665_s1 + $0x78] sm:$0xff]  ;;  %v1503_v17 = vld [vmem:[%s1665_s1 + $0x30] sm:$0xff]  ;;  %s1358_s6 = scalar_lea.vmem %s913_s5, 32  ;;  %p1359_p1 = scmp.lt.s32.totalorder %s913_s5, %s913_s5 }
   0x9   :  { %v46_v6 = vld [vmem:[#allocation2 + $0x20] sm:$0xff]  ;;  %v1514_v18 = vld [vmem:[%s1665_s1 + $0x38] sm:$0xff]  ;;  %v1529_v20 = vld [vmem:[%s1665_s1 + $0x48] sm:$0xff] }
   0xa   :  { %1053 = vmatprep.subr.mxu0 %v46_v6  ;;  %1218 = vmatprep.subr.mxu1 %v46_v6  ;;  %v1520_v19 = vld [vmem:[%s1665_s1 + $0x40] sm:$0xff] }
   0xb   :  { %1054 = vmatpush3.msra.mxu0 %v46_v6  ;;  %1221 = vmatpush3.msra.mxu1 %v46_v6  ;;  %v325_v21 = vld [vmem:[%s1664_s0 + $0x1] sm:$0x1]  ;;  %v561_v22 = vld [vmem:[%s1664_s0 + $0x2] sm:$0x1] }
   0xc   :  { %1056 = vmatmul.mubr.msk.f32.vlgmr.msra.gmra.mrb[0].mxu0 %vm47_vm0, %v1437_v7  ;;  %1071 = vmatmul.mubr.msk.f32.vlgmr.msra.gmra.mrb[0].mxu1 %vm47_vm0, %v1442_v8  ;;  %326 = vst [vmem:[#allocation2 + $0x20] sm:$0x1] %v325_v21 }
   0xd   :  { %1058 = vmatprep.mubr.msk.f32.mxu0 %vm47_vm0, %v1447_v9  ;;  %1073 = vmatprep.mubr.msk.f32.mxu1 %vm47_vm0, %v1452_v10 }
  0x10   :  { %1059 = vmatmul.mubr.msk.f32.gmra.mrb[2].mxu0 %vm47_vm0, %v1463_v11  ;;  %1074 = vmatmul.mubr.msk.f32.gmra.mrb[2].mxu1 %vm47_vm0, %v1470_v12 }
  0x11   :  { %1061 = vmatprep.mubr.msk.f32.mxu0 %vm47_vm0, %v1475_v13  ;;  %1076 = vmatprep.mubr.msk.f32.mxu1 %vm47_vm0, %v1480_v14 }
  0x13   :  { %v1540_v23 = vld [vmem:[#allocation2 + $0x20] sm:$0xff] }
  0x14   :  { %1062 = vmatmul.mubr.msk.f32.gmra.mrb[4].mxu0 %vm47_vm0, %v1491_v15  ;;  %1077 = vmatmul.mubr.msk.f32.gmra.mrb[4].mxu1 %vm47_vm0, %v1498_v16  ;;  %562 = vst [vmem:[#allocation2 + $0x20] sm:$0x1] %v561_v22 }
  0x15   :  { %1064 = vmatprep.mubr.msk.f32.mxu0 %vm47_vm0, %v1503_v17  ;;  %1089 = vmatprep.mubr.msk.f32.mxu1 %vm47_vm0, %v18_v1 }
  0x18   :  { %1065 = vmatmul.mubr.msk.f32.gmra.mrb[6].mxu0 %vm47_vm0, %v1514_v18 }
  0x19   :  { %1067 = vmatprep.mubr.msk.f32.mxu0 %vm47_vm0, %v1520_v19 }
  0x1c   :  { %1068 = vmatmul.mubr.msk.f32.gmra.mrb[8].mxu0 %vm47_vm0, %v1529_v20 }
  0x1d   :  { %1123 = vmatprep.mubr.msk.f32.mxu0 %vm47_vm0, %v18_v1 }
  0xdf   :  { %v1057_v24 = vpop.f32.mrb[0].mxu0  ;;  %v1072_v25 = vpop.f32.mrb[0].mxu1 }
  0xe0   :  { %v162_v26 = vpop.f32.mrb[1].mxu0  ;;  %v212_v27 = vpop.f32.mrb[1].mxu1  ;;  %v242_v30 = vmul.f32 0.5, %v1057_v24  ;;  %1234 = vtanh.f32 %v1072_v25 }
  0xe1   :  { %v241_v34 = vmul.f32 0.5, %v162_v26  ;;  %1236 = vtanh.f32 %v212_v27 }
  0xe3   :  { %v1060_v28 = vpop.f32.mrb[2].mxu0  ;;  %v1075_v29 = vpop.f32.mrb[2].mxu1 }
  0xe4   :  { %v244_v31 = vmul.f32 0.5, %v1060_v28  ;;  %v172_v32 = vpop.f32.mrb[3].mxu0  ;;  %v222_v33 = vpop.f32.mrb[3].mxu1  ;;  %v278_v53 = vmul.f32 0.5, %v1075_v29 }
  0xe5   :  { %v243_v35 = vmul.f32 0.5, %v172_v32  ;;  %v277_v56 = vmul.f32 0.5, %v222_v33 }
  0xe6   :  { %1238 = vtanh.f32 %v244_v31 }
  0xe7   :  { %1240 = vtanh.f32 %v243_v35  ;;  %v1063_v36 = vpop.f32.mrb[4].mxu0  ;;  %v1078_v37 = vpop.f32.mrb[4].mxu1 }
  0xe8   :  { %1242 = vtanh.f32 %v242_v30  ;;  %v258_v38 = vmul.f32 0.5, %v1063_v36  ;;  %v182_v39 = vpop.f32.mrb[5].mxu0  ;;  %v232_v40 = vpop.f32.mrb[5].mxu1  ;;  %v280_v59 = vmul.f32 0.5, %v1078_v37 }
  0xe9   :  { %1244 = vtanh.f32 %v241_v34  ;;  %v257_v41 = vmul.f32 0.5, %v182_v39  ;;  %v279_v62 = vmul.f32 0.5, %v232_v40 }
  0xea   :  { %1246 = vtanh.f32 %v258_v38  ;;  %v1235_v46 = vpop.eup %1234 }
  0xeb   :  { %1248 = vtanh.f32 %v257_v41  ;;  %v1066_v42 = vpop.f32.mrb[6].mxu0  ;;  %v1237_v47 = vpop.eup %1236 }
  0xec   :  { %v260_v43 = vmul.f32 0.5, %v1066_v42  ;;  %v192_v44 = vpop.f32.mrb[7].mxu0 }
  0xed   :  { %v259_v45 = vmul.f32 0.5, %v192_v44 }
  0xee   :  { %1250 = vtanh.f32 %v260_v43 }
  0xef   :  { %1252 = vtanh.f32 %v259_v45  ;;  %v1069_v48 = vpop.f32.mrb[8].mxu0 }
  0xf0   :  { %v1239_v49 = vpop.eup %1238  ;;  %1254 = vtanh.f32 %v1069_v48  ;;  %v202_v50 = vpop.f32.mrb[9].mxu0 }
  0xf1   :  { %v1241_v51 = vpop.eup %1240  ;;  %v252_v52 = vmul.f32 0.5, %v1239_v49  ;;  %1256 = vtanh.f32 %v202_v50 }
  0xf2   :  { %v1243_v54 = vpop.eup %1242  ;;  %v251_v55 = vmul.f32 0.5, %v1241_v51  ;;  %1258 = vtanh.f32 %v278_v53 }
  0xf3   :  { %v1245_v57 = vpop.eup %1244  ;;  %v256_v58 = vadd.f32 0.5, %v252_v52  ;;  %v250_v0 = vmul.f32 0.5, %v1243_v54  ;;  %1260 = vtanh.f32 %v277_v56 }
  0xf4   :  { %v1247_v60 = vpop.eup %1246  ;;  %v255_v61 = vadd.f32 0.5, %v251_v55  ;;  %v249_v6 = vmul.f32 0.5, %v1245_v57  ;;  %1262 = vtanh.f32 %v280_v59 }
  0xf5   :  { %v1249_v63 = vpop.eup %1248  ;;  %v266_v1 = vmul.f32 0.5, %v1247_v60  ;;  %v300_v3 = vmul.f32 %v1235_v46, %v256_v58  ;;  %1264 = vtanh.f32 %v279_v62  ;;  %v254_v28 = vadd.f32 0.5, %v250_v0 }
  0xf6   :  { %v265_v21 = vmul.f32 0.5, %v1249_v63  ;;  %v299_v22 = vmul.f32 %v1237_v47, %v255_v61  ;;  %v253_v31 = vadd.f32 0.5, %v249_v6 }
  0xf7   :  { %v270_v24 = vadd.f32 0.5, %v266_v1 }
  0xf8   :  { %v1251_v25 = vpop.eup %1250  ;;  %v269_v26 = vadd.f32 0.5, %v265_v21 }
  0xf9   :  { %v1253_v27 = vpop.eup %1252  ;;  %v268_v29 = vmul.f32 0.5, %v1251_v25  ;;  %v294_v34 = vmul.f32 0.0, %v270_v24 }
  0xfa   :  { %v1255_v30 = vpop.eup %1254  ;;  %v267_v32 = vmul.f32 0.5, %v1253_v27  ;;  %v293_v37 = vmul.f32 0.0, %v269_v26 }
  0xfb   :  { %v1257_v33 = vpop.eup %1256  ;;  %v272_v35 = vadd.f32 0.5, %v268_v29  ;;  %v298_v36 = vmul.f32 %v1255_v30, %v254_v28 }
  0xfc   :  { %v271_v38 = vadd.f32 0.5, %v267_v32  ;;  %v297_v39 = vmul.f32 %v1257_v33, %v253_v31  ;;  %v1259_v44 = vpop.eup %1258 }
  0xfd   :  { %v296_v40 = vmul.f32 0.0, %v272_v35  ;;  %v1542_v41 = vadd.f32 %v298_v36, %v294_v34  ;;  %v1261_v46 = vpop.eup %1260  ;;  %v286_v50 = vmul.f32 0.5, %v1259_v44 }
  0xfe   :  { %v295_v42 = vmul.f32 0.0, %v271_v38  ;;  %v1544_v43 = vadd.f32 %v297_v39, %v293_v37  ;;  %v1263_v48 = vpop.eup %1262  ;;  %v285_v51 = vmul.f32 0.5, %v1261_v46 }
  0xff   :  { %v1546_v45 = vadd.f32 %v300_v3, %v296_v40  ;;  %1266 = vtanh.f32 %v1542_v41  ;;  %v1265_v49 = vpop.eup %1264  ;;  %v288_v52 = vmul.f32 0.5, %v1263_v48  ;;  %v290_v54 = vadd.f32 0.5, %v286_v50 }
 0x100   :  { %v1549_v47 = vadd.f32 %v299_v22, %v295_v42  ;;  %1268 = vtanh.f32 %v1544_v43  ;;  %v287_v53 = vmul.f32 0.5, %v1265_v49  ;;  %v289_v55 = vadd.f32 0.5, %v285_v51 }
 0x101   :  { %1270 = vtanh.f32 %v1546_v45  ;;  %v292_v56 = vadd.f32 0.5, %v288_v52 }
 0x102   :  { %1272 = vtanh.f32 %v1549_v47  ;;  %v291_v58 = vadd.f32 0.5, %v287_v53 }
 0x109   :  { %v1267_v57 = vpop.eup %1266 }
 0x10a   :  { %v1269_v59 = vpop.eup %1268  ;;  %v310_v60 = vmul.f32 %v1267_v57, %v290_v54 }
 0x10b   :  { %v1271_v61 = vpop.eup %1270  ;;  %v309_v62 = vmul.f32 %v1269_v59, %v289_v55 }
 0x10c   :  { %v1273_v63 = vpop.eup %1272  ;;  %v318_v0 = vmax.f32 %v310_v60, 0.0  ;;  %v312_v1 = vmul.f32 %v1271_v61, %v292_v56 }
 0x10d   :  { %v317_v3 = vmax.f32 %v309_v62, 0.0  ;;  %v311_v6 = vmul.f32 %v1273_v63, %v291_v58  ;;  %v1182_v21 = vpack.c.bf16 %v310_v60, %v309_v62 }
 0x10e   :  { %v320_v22 = vmax.f32 %v312_v1, 0.0 }
 0x10f   :  { %v319_v24 = vmax.f32 %v311_v6, 0.0  ;;  %1183 = vmatprep.subr.bf16.mxu1 %v1182_v21  ;;  %v1186_v25 = vpack.c.bf16 %v312_v1, %v311_v6  ;;  %v1199_v26 = vpack.c.bf16 %v318_v0, %v317_v3 }
 0x110   :  { %1185 = vmatpush3.bf16.msra.mxu1 %v1182_v21 }
 0x111   :  { %1187 = vmatprep.subr.bf16.mxu1 %v1186_v25  ;;  %v1202_v27 = vpack.c.bf16 %v320_v22, %v319_v24 }
 0x114   :  { %1189 = vmatpush3.bf16.msra.mxu1 %v1186_v25 }
 0x115   :  { %1087 = vmatprep.subr.mxu1 %v1540_v23 }
 0x118   :  { %1088 = vmatpush3.msra.mxu1 %v1540_v23 }
 0x119   :  { %1090 = vmatmul.mubr.msk.f32.vlgmr.msra.gmra.mrb[6].mxu1 %vm47_vm0, %v1437_v7  ;;  %1198 = vmatprep.subr.bf16.mxu1 %v1380_v4 }
 0x11a   :  { %1200 = vmatpush3.bf16.msra.mxu1 %v1199_v26  ;;  %1092 = vmatprep.mubr.msk.f32.mxu1 %vm47_vm0, %v1447_v9 }
 0x11b   :  { %1201 = vmatprep.subr.bf16.mxu1 %v1380_v4 }
 0x11d   :  { %1093 = vmatmul.mubr.msk.f32.gmra.mrb[8].mxu1 %vm47_vm0, %v1463_v11 }
 0x11e   :  { %1203 = vmatpush3.bf16.msra.mxu1 %v1202_v27  ;;  %1095 = vmatprep.mubr.msk.f32.mxu1 %vm47_vm0, %v1475_v13 }
 0x11f   :  { %1204 = vmatprep.subr.bf16.mxu1 %v1380_v4 }
 0x121   :  { %1096 = vmatmul.mubr.msk.f32.gmra.mrb[10].mxu1 %vm47_vm0, %v1491_v15 }
 0x122   :  { %1098 = vmatprep.mubr.msk.f32.mxu1 %vm47_vm0, %v1503_v17 }
 0x125   :  { %1099 = vmatmul.mubr.msk.f32.gmra.mrb[12].mxu1 %vm47_vm0, %v1514_v18 }
 0x126   :  { %1101 = vmatprep.mubr.msk.f32.mxu1 %vm47_vm0, %v1520_v19 }
 0x129   :  { %1102 = vmatmul.mubr.msk.f32.gmra.mrb[14].mxu1 %vm47_vm0, %v1529_v20 }
 0x12a   :  { %1104 = vmatprep.mubr.msk.f32.mxu1 %vm47_vm0, %v1424_v5 }
 0x12d   :  { %1105 = vmatmul.mubr.msk.f32.gmra.mrb[16].mxu1 %vm47_vm0, %v1442_v8 }
 0x12e   :  { %1107 = vmatprep.mubr.msk.f32.mxu1 %vm47_vm0, %v1452_v10 }
 0x131   :  { %1108 = vmatmul.mubr.msk.f32.gmra.mrb[18].mxu1 %vm47_vm0, %v1470_v12 }
 0x132   :  { %1110 = vmatprep.mubr.msk.f32.mxu1 %vm47_vm0, %v1480_v14 }
 0x135   :  { %1111 = vmatmul.mubr.msk.f32.gmra.mrb[20].mxu1 %vm47_vm0, %v1498_v16 }
 0x136   :  { %1171 = vmatprep.mubr.msk.f32.mxu1 %vm1381_vm1, %v1378_v2 }
 0x1ec   :  { %v1091_v23 = vpop.f32.mrb[6].mxu1 }
 0x1ed   :  { %v398_v28 = vpop.f32.mrb[7].mxu1  ;;  %v478_v30 = vmul.f32 0.5, %v1091_v23 }
 0x1ee   :  { %v477_v32 = vmul.f32 0.5, %v398_v28 }
 0x1ef   :  { %1274 = vtanh.f32 %v478_v30 }
 0x1f0   :  { %v1094_v29 = vpop.f32.mrb[8].mxu1  ;;  %1276 = vtanh.f32 %v477_v32 }
 0x1f1   :  { %v408_v31 = vpop.f32.mrb[9].mxu1  ;;  %v480_v34 = vmul.f32 0.5, %v1094_v29 }
 0x1f2   :  { %v479_v37 = vmul.f32 0.5, %v408_v31 }
 0x1f4   :  { %v1097_v33 = vpop.f32.mrb[10].mxu1 }
 0x1f5   :  { %v494_v35 = vmul.f32 0.5, %v1097_v33  ;;  %v418_v36 = vpop.f32.mrb[11].mxu1 }
 0x1f6   :  { %v493_v38 = vmul.f32 0.5, %v418_v36 }
 0x1f7   :  { %1278 = vtanh.f32 %v494_v35 }
 0x1f8   :  { %1280 = vtanh.f32 %v493_v38  ;;  %v1100_v39 = vpop.f32.mrb[12].mxu1 }
 0x1f9   :  { %1282 = vtanh.f32 %v480_v34  ;;  %v496_v40 = vmul.f32 0.5, %v1100_v39  ;;  %v428_v42 = vpop.f32.mrb[13].mxu1  ;;  %v1275_v49 = vpop.eup %1274 }
 0x1fa   :  { %1284 = vtanh.f32 %v479_v37  ;;  %v495_v44 = vmul.f32 0.5, %v428_v42  ;;  %v1277_v50 = vpop.eup %1276  ;;  %v486_v55 = vmul.f32 0.5, %v1275_v49 }
 0x1fb   :  { %1286 = vtanh.f32 %v496_v40  ;;  %v485_v58 = vmul.f32 0.5, %v1277_v50 }
 0x1fc   :  { %1288 = vtanh.f32 %v495_v44  ;;  %v1103_v46 = vpop.f32.mrb[14].mxu1  ;;  %v490_v21 = vadd.f32 0.5, %v486_v55 }
 0x1fd   :  { %1290 = vtanh.f32 %v1103_v46  ;;  %v438_v48 = vpop.f32.mrb[15].mxu1  ;;  %v489_v27 = vadd.f32 0.5, %v485_v58 }
 0x1fe   :  { %1292 = vtanh.f32 %v438_v48 }
 0x200   :  { %v1106_v51 = vpop.f32.mrb[16].mxu1 }
 0x201   :  { %v1279_v52 = vpop.eup %1278  ;;  %1294 = vtanh.f32 %v1106_v51  ;;  %v448_v53 = vpop.f32.mrb[17].mxu1 }
 0x202   :  { %v1281_v54 = vpop.eup %1280  ;;  %v502_v56 = vmul.f32 0.5, %v1279_v52  ;;  %1296 = vtanh.f32 %v448_v53 }
 0x203   :  { %v1283_v57 = vpop.eup %1282  ;;  %v501_v59 = vmul.f32 0.5, %v1281_v54 }
 0x204   :  { %v1285_v60 = vpop.eup %1284  ;;  %v506_v61 = vadd.f32 0.5, %v502_v56  ;;  %v1109_v62 = vpop.f32.mrb[18].mxu1  ;;  %v488_v22 = vmul.f32 0.5, %v1283_v57 }
 0x205   :  { %v1287_v63 = vpop.eup %1286  ;;  %v505_v0 = vadd.f32 0.5, %v501_v59  ;;  %v514_v1 = vmul.f32 0.5, %v1109_v62  ;;  %v458_v3 = vpop.f32.mrb[19].mxu1  ;;  %v487_v23 = vmul.f32 0.5, %v1285_v60 }
 0x206   :  { %v1289_v6 = vpop.eup %1288  ;;  %v504_v24 = vmul.f32 0.5, %v1287_v63  ;;  %v513_v25 = vmul.f32 0.5, %v458_v3  ;;  %v530_v30 = vmul.f32 %v506_v61, %v1542_v41  ;;  %v492_v39 = vadd.f32 0.5, %v488_v22 }
 0x207   :  { %v1291_v26 = vpop.eup %1290  ;;  %v503_v28 = vmul.f32 0.5, %v1289_v6  ;;  %1298 = vtanh.f32 %v514_v1  ;;  %v529_v34 = vmul.f32 %v505_v0, %v1544_v43  ;;  %v491_v46 = vadd.f32 0.5, %v487_v23 }
 0x208   :  { %v1293_v29 = vpop.eup %1292  ;;  %v508_v31 = vadd.f32 0.5, %v504_v24  ;;  %v534_v32 = vmul.f32 %v1291_v26, %v490_v21  ;;  %1300 = vtanh.f32 %v513_v25  ;;  %v1112_v33 = vpop.f32.mrb[20].mxu1 }
 0x209   :  { %v507_v35 = vadd.f32 0.5, %v503_v28  ;;  %v533_v36 = vmul.f32 %v1293_v29, %v489_v27  ;;  %v516_v37 = vmul.f32 0.5, %v1112_v33  ;;  %v468_v38 = vpop.f32.mrb[21].mxu1 }
 0x20a   :  { %v1591_v40 = vadd.f32 %v534_v32, %v530_v30  ;;  %v515_v42 = vmul.f32 0.5, %v468_v38  ;;  %v532_v49 = vmul.f32 %v508_v31, %v1546_v45  ;;  %v567_v32 = vld [vmem:[#allocation2 + $0x20] sm:$0xff] }
 0x20b   :  { %v1295_v44 = vpop.eup %1294  ;;  %v1593_v48 = vadd.f32 %v533_v36, %v529_v34  ;;  %1302 = vtanh.f32 %v516_v37  ;;  %v531_v43 = vmul.f32 %v507_v35, %v1549_v47 }
 0x20c   :  { %v1297_v41 = vpop.eup %1296  ;;  %1304 = vtanh.f32 %v1591_v40  ;;  %v536_v50 = vmul.f32 %v1295_v44, %v492_v39 }
 0x20d   :  { %1306 = vtanh.f32 %v1593_v48  ;;  %v535_v51 = vmul.f32 %v1297_v41, %v491_v46 }
 0x20e   :  { %v1599_v52 = vadd.f32 %v536_v50, %v532_v49  ;;  %1308 = vtanh.f32 %v515_v42 }
 0x20f   :  { %v1601_v53 = vadd.f32 %v535_v51, %v531_v43 }
 0x210   :  { %1310 = vtanh.f32 %v1599_v52 }
 0x211   :  { %v1299_v54 = vpop.eup %1298  ;;  %1312 = vtanh.f32 %v1601_v53 }
 0x212   :  { %v1301_v55 = vpop.eup %1300  ;;  %v522_v45 = vmul.f32 0.5, %v1299_v54 }
 0x213   :  { %v521_v56 = vmul.f32 0.5, %v1301_v55 }
 0x214   :  { %v526_v57 = vadd.f32 0.5, %v522_v45 }
 0x215   :  { %v1303_v58 = vpop.eup %1302  ;;  %v525_v59 = vadd.f32 0.5, %v521_v56 }
 0x216   :  { %v1305_v47 = vpop.eup %1304  ;;  %v524_v60 = vmul.f32 0.5, %v1303_v58 }
 0x217   :  { %v1307_v61 = vpop.eup %1306  ;;  %v546_v62 = vmul.f32 %v1305_v47, %v526_v57 }
 0x218   :  { %v1309_v63 = vpop.eup %1308  ;;  %v545_v0 = vmul.f32 %v1307_v61, %v525_v59  ;;  %v528_v1 = vadd.f32 0.5, %v524_v60 }
 0x219   :  { %v554_v3 = vmax.f32 %v546_v62, 0.0  ;;  %v523_v6 = vmul.f32 0.5, %v1309_v63 }
 0x21a   :  { %v1311_v21 = vpop.eup %1310  ;;  %v553_v22 = vmax.f32 %v545_v0, 0.0  ;;  %v1190_v24 = vpack.c.bf16 %v546_v62, %v545_v0 }
 0x21b   :  { %v1313_v25 = vpop.eup %1312  ;;  %v548_v26 = vmul.f32 %v1311_v21, %v528_v1  ;;  %v527_v27 = vadd.f32 0.5, %v523_v6 }
 0x21c   :  { %v1205_v23 = vpack.c.bf16 %v554_v3, %v553_v22  ;;  %1191 = vmatprep.subr.bf16.mxu0 %v1190_v24 }
 0x21d   :  { %v556_v28 = vmax.f32 %v548_v26, 0.0  ;;  %v547_v29 = vmul.f32 %v1313_v25, %v527_v27  ;;  %1193 = vmatpush3.bf16.msra.mxu0 %v1190_v24 }
 0x21e   :  { %1206 = vmatpush3.bf16.msra.mxu1 %v1205_v23 }
 0x21f   :  { %v555_v30 = vmax.f32 %v547_v29, 0.0  ;;  %1207 = vmatprep.subr.bf16.mxu1 %v1380_v4  ;;  %v1194_v31 = vpack.c.bf16 %v548_v26, %v547_v29 }
 0x221   :  { %v1208_v33 = vpack.c.bf16 %v556_v28, %v555_v30  ;;  %1195 = vmatprep.subr.bf16.mxu0 %v1194_v31 }
 0x222   :  { %1197 = vmatpush3.bf16.msra.mxu0 %v1194_v31 }
 0x223   :  { %1209 = vmatpush3.bf16.msra.mxu1 %v1208_v33  ;;  %1121 = vmatprep.subr.mxu0 %v567_v32 }
 0x224   :  { %1210 = vmatprep.subr.bf16.mxu1 %v1380_v4 }
 0x226   :  { %1122 = vmatpush3.msra.mxu0 %v567_v32 }
 0x227   :  { %1124 = vmatmul.mubr.msk.f32.vlgmr.msra.gmra.mrb[10].mxu0 %vm47_vm0, %v1437_v7  ;;  %v898_v7 = vld [vmem:[%s1667_s3] sm:$0x1] }
 0x228   :  { %1126 = vmatprep.mubr.msk.f32.mxu0 %vm47_vm0, %v1447_v9  ;;  %v1383_v9 = vmov 2  }
 0x229   :  { %1232 = vset.pattern.permute.xlu1 %v1383_v9 }
 0x22a   :  { %901 = vperm.xlu1 %1232, %v898_v7  }
 0x22b   :  { %1127 = vmatmul.mubr.msk.f32.gmra.mrb[12].mxu0 %vm47_vm0, %v1463_v11 }
 0x22c   :  { %1129 = vmatprep.mubr.msk.f32.mxu0 %vm47_vm0, %v1475_v13 }
 0x22f   :  { %1130 = vmatmul.mubr.msk.f32.gmra.mrb[14].mxu0 %vm47_vm0, %v1491_v15 }
 0x230   :  { %1132 = vmatprep.mubr.msk.f32.mxu0 %vm47_vm0, %v1503_v17 }
 0x233   :  { %1133 = vmatmul.mubr.msk.f32.gmra.mrb[16].mxu0 %vm47_vm0, %v1514_v18 }
 0x234   :  { %1135 = vmatprep.mubr.msk.f32.mxu0 %vm47_vm0, %v1520_v19 }
 0x237   :  { %1136 = vmatmul.mubr.msk.f32.gmra.mrb[18].mxu0 %vm47_vm0, %v1529_v20 }
 0x238   :  { %1138 = vmatprep.mubr.msk.f32.mxu0 %vm47_vm0, %v1424_v5  ;;  %v806_v5 = vld [vmem:[%s1667_s3] sm:$0xff] }
 0x23b   :  { %1139 = vmatmul.mubr.msk.f32.gmra.mrb[20].mxu0 %vm47_vm0, %v1442_v8  ;;  %v1382_v8 = vmov 0  }
 0x23c   :  { %1141 = vmatprep.mubr.msk.f32.mxu0 %vm47_vm0, %v1452_v10  ;;  %1230 = vset.pattern.permute.xlu0 %v1382_v8  ;;  %v1384_v10 = vmov 1  }
 0x23d   :  { %809 = vperm.xlu0 %1230, %v806_v5  }
 0x23f   :  { %1142 = vmatmul.mubr.msk.f32.gmra.mrb[22].mxu0 %vm47_vm0, %v1470_v12 }
 0x240   :  { %1144 = vmatprep.mubr.msk.f32.mxu0 %vm47_vm0, %v1480_v14 }
 0x241   :  { %1231 = vset.pattern.permute.xlu0 %v1384_v10 }
 0x242   :  { %888 = vperm.xlu0 %1231, %v806_v5  }
 0x243   :  { %1145 = vmatmul.mubr.msk.f32.gmra.mrb[24].mxu0 %vm47_vm0, %v1498_v16 }
 0x246   :  { %1233 = vset.pattern.permute.xlu0 %v1383_v9 }
 0x2fa   :  { %v1125_v11 = vpop.f32.mrb[10].mxu0 }
 0x2fb   :  { %v634_v2 = vpop.f32.mrb[11].mxu0  ;;  %v714_v13 = vmul.f32 0.5, %v1125_v11 }
 0x2fc   :  { %v713_v15 = vmul.f32 0.5, %v634_v2 }
 0x2fd   :  { %1314 = vtanh.f32 %v714_v13 }
 0x2fe   :  { %v1128_v12 = vpop.f32.mrb[12].mxu0  ;;  %1316 = vtanh.f32 %v713_v15 }
 0x2ff   :  { %v644_v14 = vpop.f32.mrb[13].mxu0  ;;  %v716_v17 = vmul.f32 0.5, %v1128_v12 }
 0x300   :  { %v715_v20 = vmul.f32 0.5, %v644_v14 }
 0x302   :  { %v1131_v16 = vpop.f32.mrb[14].mxu0 }
 0x303   :  { %v730_v18 = vmul.f32 0.5, %v1131_v16  ;;  %v654_v19 = vpop.f32.mrb[15].mxu0 }
 0x304   :  { %v729_v34 = vmul.f32 0.5, %v654_v19 }
 0x305   :  { %1318 = vtanh.f32 %v730_v18 }
 0x306   :  { %1320 = vtanh.f32 %v729_v34  ;;  %v1134_v35 = vpop.f32.mrb[16].mxu0 }
 0x307   :  { %1322 = vtanh.f32 %v716_v17  ;;  %v732_v36 = vmul.f32 0.5, %v1134_v35  ;;  %v664_v37 = vpop.f32.mrb[17].mxu0  ;;  %v1315_v44 = vpop.eup %1314 }
 0x308   :  { %1324 = vtanh.f32 %v715_v20  ;;  %v731_v38 = vmul.f32 0.5, %v664_v37  ;;  %v1317_v46 = vpop.eup %1316  ;;  %v722_v51 = vmul.f32 0.5, %v1315_v44 }
 0x309   :  { %1326 = vtanh.f32 %v732_v36  ;;  %v721_v45 = vmul.f32 0.5, %v1317_v46 }
 0x30a   :  { %1328 = vtanh.f32 %v731_v38  ;;  %v1137_v39 = vpop.f32.mrb[18].mxu0  ;;  %v726_v0 = vadd.f32 0.5, %v722_v51 }
 0x30b   :  { %1330 = vtanh.f32 %v1137_v39  ;;  %v674_v42 = vpop.f32.mrb[19].mxu0  ;;  %v725_v22 = vadd.f32 0.5, %v721_v45 }
 0x30c   :  { %1332 = vtanh.f32 %v674_v42 }
 0x30e   :  { %v1140_v41 = vpop.f32.mrb[20].mxu0 }
 0x30f   :  { %v1319_v49 = vpop.eup %1318  ;;  %1334 = vtanh.f32 %v1140_v41  ;;  %v684_v50 = vpop.f32.mrb[21].mxu0 }
 0x310   :  { %v1321_v43 = vpop.eup %1320  ;;  %v738_v54 = vmul.f32 0.5, %v1319_v49  ;;  %1336 = vtanh.f32 %v684_v50 }
 0x311   :  { %v1323_v55 = vpop.eup %1322  ;;  %v737_v56 = vmul.f32 0.5, %v1321_v43 }
 0x312   :  { %v1325_v57 = vpop.eup %1324  ;;  %v742_v58 = vadd.f32 0.5, %v738_v54  ;;  %v1143_v59 = vpop.f32.mrb[22].mxu0  ;;  %v724_v1 = vmul.f32 0.5, %v1323_v55 }
 0x313   :  { %v1327_v47 = vpop.eup %1326  ;;  %v741_v60 = vadd.f32 0.5, %v737_v56  ;;  %v750_v61 = vmul.f32 0.5, %v1143_v59  ;;  %v694_v62 = vpop.f32.mrb[23].mxu0  ;;  %v723_v24 = vmul.f32 0.5, %v1325_v57  ;;  %v793_v59 = vld [vmem:[%s1666_s2] sm:$0xff]  ;;  %s1354_s2 = scalar_lea.vmem %s913_s5, 16 }
 0x314   :  { %v1329_v63 = vpop.eup %1328  ;;  %v740_v3 = vmul.f32 0.5, %v1327_v47  ;;  %v749_v6 = vmul.f32 0.5, %v694_v62  ;;  %v766_v27 = vmul.f32 %v742_v58, %v1591_v40  ;;  %v728_v7 = vadd.f32 0.5, %v724_v1  ;;  %v810_v47 = vpop.permute.xlu0 %809  ;;  %p1355_p0 = scmp.ne.s32.totalorder %s913_s5, %s1354_s2  ;;  %p1360_p2 = scmp.lt.s32.totalorder %s1358_s6, %s1354_s2 }
 0x315   :  { %v1331_v21 = vpop.eup %1330  ;;  %v739_v25 = vmul.f32 0.5, %v1329_v63  ;;  %1338 = vtanh.f32 %v750_v61  ;;  %v765_v30 = vmul.f32 %v741_v60, %v1593_v48  ;;  %v727_v11 = vadd.f32 0.5, %v723_v24  ;;  %v902_v24 = vpop.permute.xlu1 %901 }
 0x316   :  { %v1333_v26 = vpop.eup %1332  ;;  %v744_v23 = vadd.f32 0.5, %v740_v3  ;;  %v770_v28 = vmul.f32 %v1331_v21, %v726_v0  ;;  %1340 = vtanh.f32 %v749_v6  ;;  %v1146_v29 = vpop.f32.mrb[24].mxu0  ;;  %p1361_p3 = por %p1360_p2, %p1359_p1 }
 0x317   :  { %v743_v31 = vadd.f32 0.5, %v739_v25  ;;  %v769_v32 = vmul.f32 %v1333_v26, %v725_v22  ;;  %v752_v33 = vmul.f32 0.5, %v1146_v29  ;;  %v704_v5 = vpop.f32.mrb[25].mxu0 }
 0x318   :  { %v774_v8 = vadd.f32 %v770_v28, %v766_v27  ;;  %v751_v9 = vmul.f32 0.5, %v704_v5  ;;  %v768_v40 = vmul.f32 %v744_v23, %v1599_v52  ;;  %v889_v63 = vpop.permute.xlu0 %888  ;;  %p1362_p4 = pnand %p1361_p3, %p1355_p0 }
 0x319   :  { %v1335_v10 = vpop.eup %1334  ;;  %v773_v2 = vadd.f32 %v769_v32, %v765_v30  ;;  %1342 = vtanh.f32 %v752_v33  ;;  %v767_v14 = vmul.f32 %v743_v31, %v1601_v53 }
 0x31a   :  { %v1337_v12 = vpop.eup %1336  ;;  %1344 = vtanh.f32 %v774_v8  ;;  %v772_v13 = vmul.f32 %v1335_v10, %v728_v7 }
 0x31b   :  { %1346 = vtanh.f32 %v773_v2  ;;  %v771_v48 = vmul.f32 %v1337_v12, %v727_v11 }
 0x31c   :  { %v776_v15 = vadd.f32 %v772_v13, %v768_v40  ;;  %1348 = vtanh.f32 %v751_v9 }
 0x31d   :  { %v775_v16 = vadd.f32 %v771_v48, %v767_v14 }
 0x31e   :  { %1350 = vtanh.f32 %v776_v15 }
 0x31f   :  { %v1339_v17 = vpop.eup %1338  ;;  %1352 = vtanh.f32 %v775_v16 }
 0x320   :  { %v1341_v18 = vpop.eup %1340  ;;  %v758_v19 = vmul.f32 0.5, %v1339_v17 }
 0x321   :  { %v757_v20 = vmul.f32 0.5, %v1341_v18 }
 0x322   :  { %v762_v34 = vadd.f32 0.5, %v758_v19 }
 0x323   :  { %v1343_v35 = vpop.eup %1342  ;;  %v761_v36 = vadd.f32 0.5, %v757_v20 }
 0x324   :  { %v1345_v37 = vpop.eup %1344  ;;  %v760_v52 = vmul.f32 0.5, %v1343_v35 }
 0x325   :  { %v1347_v38 = vpop.eup %1346  ;;  %v782_v39 = vmul.f32 %v1345_v37, %v762_v34 }
 0x326   :  { %v1349_v42 = vpop.eup %1348  ;;  %v781_v53 = vmul.f32 %v1347_v38, %v761_v36  ;;  %v764_v44 = vadd.f32 0.5, %v760_v52 }
 0x327   :  { %v786_v46 = vmax.f32 %v782_v39, 0.0  ;;  %v759_v41 = vmul.f32 0.5, %v1349_v42 }
 0x328   :  { %v1351_v49 = vpop.eup %1350  ;;  %v785_v50 = vmax.f32 %v781_v53, 0.0 }
 0x329   :  { %v1353_v43 = vpop.eup %1352  ;;  %v784_v51 = vmul.f32 %v1351_v49, %v764_v44  ;;  %v763_v54 = vadd.f32 0.5, %v759_v41 }
 0x32a   :  { %v1211_v55 = vpack.c.bf16 %v786_v46, %v785_v50 }
 0x32b   :  { %v788_v45 = vmax.f32 %v784_v51, 0.0  ;;  %v783_v56 = vmul.f32 %v1353_v43, %v763_v54 }
 0x32c   :  { %1212 = vmatpush3.bf16.msra.mxu1 %v1211_v55 }
 0x32d   :  { %v787_v57 = vmax.f32 %v783_v56, 0.0  ;;  %1213 = vmatprep.subr.bf16.mxu1 %v1380_v4 }
 0x32f   :  { %v1214_v58 = vpack.c.bf16 %v788_v45, %v787_v57 }
 0x331   :  { %1215 = vmatpush3.bf16.msra.mxu1 %v1214_v58 }
 0x334   :  { %1172 = vmatmul.mubr.msk.f32.vlgmr.msra.gmra.mrb[22].mxu1 %vm812_vm2, %v793_v59 }
 0x407   :  { %v882_v60 = vpop.f32.mrb[22].mxu1 }
 0x408   :  { %v883_v61 = vadd.f32 %v882_v60, %v810_v47  ;;  %v1173_v62 = vpop.f32.mrb[23].mxu1 }
 0x40a   :  { %v886_v0 = vmax.f32 %v883_v61, 0.0 }
 0x40c   :  { %v891_v1 = vmul.f32 %v889_v63, %v886_v0 }
 0x40e   :  { %v892_v3 = vrot.slane %v891_v1, 4 }
 0x410   :  { %v893_v6 = vadd.f32 %v892_v3, %v891_v1 }
 0x412   :  { %v894_v21 = vrot.slane %v893_v6, 2 }
 0x414   :  { %v895_v22 = vadd.f32 %v894_v21, %v893_v6 }
 0x416   :  { %v896_v4 = vrot.slane %v895_v22, 1 }
 0x418   :  { %v897_v25 = vadd.f32 %v896_v4, %v895_v22 }
 0x41a   :  { %v904_v26 = vadd.f32 %v902_v24, %v897_v25 }
 0x41c   :  { %905 = vst [vmem:[#allocation4] sm:$0x1] %v904_v26 }
 0x41d   :  { %1365 = shalt.err (!%p1362_p4)
}
 0x41e   :  { %s1366_s9 = scalar_lea.hbm %s1668_s4, 16 }
 0x41f   :  { %p1367_p5 = scmp.ne.s32.totalorder %s1668_s4, %s1366_s9  ;;  %p1370_p6 = scmp.lt.u32.totalorder %s1366_s9, %s1668_s4 }
 0x421   :  { %p1372_p7 = pnand %p1370_p6, %p1367_p5 }
 0x423   :  { %1375 = shalt.err (!%p1372_p7)
}
 0x424   :  { %915 = dma.vmem_to_hbm [thread:$0]  %s913_s5, 16, %s1668_s4, [#allocation5]  }
 0x425   :  { %1376 = dma.done.wait [#allocation5], 16  }
 0x426   :  { %1377 = vsyncadd [#allocation5], 4294967280 }
 0x427   :  { %919 = vsyncpa [#allocation5], 1 }

</bundles_post_ra>
